<compile_context>
chip_gen: v6e
topology: v6e:2x2x1
jax: 0.10.0
libtpu: 0.0.40
codegen_flags: <defaults>
</compile_context>

<pallas_src>
import jax
import jax.numpy as jnp
from jax.experimental import pallas as pl
from jax.experimental.pallas import tpu as pltpu


def _round_up(x, m):
    return (x + m - 1) // m * m


def mlp_kernel(x_ref, w1_ref, b1_ref, w2_ref, b2_ref, o_ref):
    # Layer 1: x @ W1 on the MXU with f32 accumulation; bias + sigmoid in f32
    # (sigmoid lowers to EUP transcendentals -> essentially free slot-wise).
    h = jnp.dot(x_ref[...], w1_ref[...], preferred_element_type=jnp.float32)
    h = jax.nn.sigmoid(h + b1_ref[...])
    # Layer 2: cast h back to the matmul dtype (bf16 on v6e/v7x) so the second
    # matmul also runs at MXU peak; accumulate f32, sigmoid in f32.
    y = jnp.dot(h.astype(w2_ref.dtype), w2_ref[...],
                preferred_element_type=jnp.float32)
    o_ref[...] = jax.nn.sigmoid(y + b2_ref[...]).astype(o_ref.dtype)


def net_forward(x, w1, b1, w2, b2, *, bm=256, compute_dtype=None,
                single_buffer_weights=False):
    """Forward pass of Net.

    x : (N, D_in)   activations (PyTorch nn.Linear input layout)
    w1: (D_in, H)   linear1 weight, stored pre-transposed vs. PyTorch
    b1: (1, H)
    w2: (H, D_out)  linear2 weight, stored pre-transposed vs. PyTorch
    b2: (1, D_out)

    compute_dtype: dtype fed to the MXU (jnp.bfloat16 recommended on v6e/v7x;
                   leave None -> x.dtype, i.e. f32, on v5e).  Accumulation,
                   bias add and sigmoid always stay in f32.
    single_buffer_weights: set True on v7x (64 MiB VMEM) to keep the
                   grid-invariant weights/biases single-buffered.
    """
    N, D_in = x.shape
    assert w1.shape[0] == D_in
    H = w1.shape[1]
    assert w2.shape[0] == H
    D_out = w2.shape[1]

    out_dtype = x.dtype
    cdt = jnp.dtype(out_dtype if compute_dtype is None else compute_dtype)

    # Pad feature dims to lane multiples (128) and the batch to a tile multiple.
    Dp = _round_up(D_in, 128)
    Hp = _round_up(H, 128)
    Op = _round_up(D_out, 128)
    bm = max(8, min(bm, _round_up(N, 8)))   # don't over-pad tiny batches
    Np = _round_up(N, bm)

    # Zero padding keeps the math exact: padded D_in columns multiply zero W1
    # rows; padded H columns produce sigmoid(0)=0.5 but hit zero W2 rows;
    # padded D_out columns are sliced off below.
    xp = jnp.pad(x.astype(cdt), ((0, Np - N), (0, Dp - D_in)))
    w1p = jnp.pad(w1.astype(cdt), ((0, Dp - D_in), (0, Hp - H)))
    b1p = jnp.pad(b1.astype(jnp.float32), ((0, 0), (0, Hp - H)))
    w2p = jnp.pad(w2.astype(cdt), ((0, Hp - H), (0, Op - D_out)))
    b2p = jnp.pad(b2.astype(jnp.float32), ((0, 0), (0, Op - D_out)))

    # Grid-invariant operands; optionally single-buffer them (v7x VMEM budget).
    w_mode = dict(pipeline_mode=pl.Buffered(1)) if single_buffer_weights else {}

    grid = (Np // bm,)

    itemsize = cdt.itemsize
    out_itemsize = jnp.dtype(out_dtype).itemsize
    nbuf_w = 1 if single_buffer_weights else 2
    vmem_est = (
        2 * bm * Dp * itemsize                      # x tiles (double-buffered)
        + 2 * bm * Op * out_itemsize                # out tiles (double-buffered)
        + nbuf_w * (Dp * Hp + Hp * Op) * itemsize   # resident weights
        + nbuf_w * (Hp + Op) * 4                    # resident biases (f32)
        + bm * (Hp + Op) * 4                        # f32 intermediates
    )
    vmem_limit = int(min(max(32 << 20, 2 * vmem_est), 64 << 20))

    cost = pl.CostEstimate(
        flops=2 * Np * (Dp * Hp + Hp * Op),
        transcendentals=Np * (Hp + Op),
        bytes_accessed=(xp.size * itemsize
                        + (w1p.size + w2p.size) * itemsize
                        + (b1p.size + b2p.size) * 4
                        + Np * Op * out_itemsize),
    )

    out = pl.pallas_call(
        mlp_kernel,
        out_shape=jax.ShapeDtypeStruct((Np, Op), out_dtype),
        grid=grid,
        in_specs=[
            pl.BlockSpec((bm, Dp), lambda i: (i, 0)),            # batch-tiled x
            pl.BlockSpec((Dp, Hp), lambda i: (0, 0), **w_mode),  # W1 resident
            pl.BlockSpec((1, Hp), lambda i: (0, 0), **w_mode),   # b1
            pl.BlockSpec((Hp, Op), lambda i: (0, 0), **w_mode),  # W2 resident
            pl.BlockSpec((1, Op), lambda i: (0, 0), **w_mode),   # b2
        ],
        out_specs=pl.BlockSpec((bm, Op), lambda i: (i, 0)),      # lane-dense out
        compiler_params=pltpu.CompilerParams(
            dimension_semantics=("parallel",),  # batch axis -> both TCs on v7x
            vmem_limit_bytes=vmem_limit),
        cost_estimate=cost,
    )(xp, w1p, b1p, w2p, b2p)

    return out[:N, :D_out]


def init_params(key, D_in, H, D_out, dtype=jnp.float32):
    """Deterministic PyTorch-style init: U(-1/sqrt(fan_in), 1/sqrt(fan_in))."""
    k1, k2, k3, k4 = jax.random.split(key, 4)
    bound1 = 1.0 / jnp.sqrt(D_in)
    bound2 = 1.0 / jnp.sqrt(H)
    # Stored pre-transposed relative to PyTorch's (out_features, in_features).
    w1 = jax.random.uniform(k1, (D_in, H), dtype, -bound1, bound1)
    b1 = jax.random.uniform(k2, (1, H), dtype, -bound1, bound1)
    w2 = jax.random.uniform(k3, (H, D_out), dtype, -bound2, bound2)
    b2 = jax.random.uniform(k4, (1, D_out), dtype, -bound2, bound2)
    return w1, b1, w2, b2


if __name__ == "__main__":
    # Small shapes consistent with Net(D_in, H, D_out).
    N, D_in, H, D_out = 8, 32, 32, 16

    key = jax.random.PRNGKey(0)
    kx, kp = jax.random.split(key)
    x = jax.random.normal(kx, (N, D_in), jnp.float32)
    w1, b1, w2, b2 = init_params(kp, D_in, H, D_out)

    # Pure-JAX reference.
    ref = jax.nn.sigmoid(jax.nn.sigmoid(x @ w1 + b1) @ w2 + b2)

    # f32 MXU path (default; recommended on v5e) — exact vs. reference.
    out_f32 = jax.block_until_ready(net_forward(x, w1, b1, w2, b2))
    assert out_f32.shape == (N, D_out)
    assert jnp.allclose(out_f32, ref, atol=1e-5, rtol=1e-5)

    # bf16 MXU path with f32 accumulation (recommended on v6e/v7x).
    out_bf16 = jax.block_until_ready(
        net_forward(x, w1, b1, w2, b2, compute_dtype=jnp.bfloat16))
    assert out_bf16.shape == (N, D_out)
    assert jnp.allclose(out_bf16, ref, atol=3e-2, rtol=3e-2)

    # Larger ragged batch exercises the tiled/padded path (grid > 1 step).
    N2 = 1000
    x2 = jax.random.normal(jax.random.PRNGKey(1), (N2, D_in), jnp.float32)
    ref2 = jax.nn.sigmoid(jax.nn.sigmoid(x2 @ w1 + b1) @ w2 + b2)
    out2 = jax.block_until_ready(net_forward(x2, w1, b1, w2, b2))
    assert out2.shape == (N2, D_out)
    assert jnp.allclose(out2, ref2, atol=1e-5, rtol=1e-5)

    print("KERNEL_OK")
</pallas_src>

<mosaic_0001>
module attributes {stable_mosaic.version = 11 : i64} {
  func.func @mlp_kernel(%arg0: i32, %arg1: memref<8x128xf32, #tpu.memory_space<vmem>>, %arg2: memref<128x128xf32, #tpu.memory_space<vmem>>, %arg3: memref<1x128xf32, #tpu.memory_space<vmem>>, %arg4: memref<128x128xf32, #tpu.memory_space<vmem>>, %arg5: memref<1x128xf32, #tpu.memory_space<vmem>>, %arg6: memref<8x128xf32, #tpu.memory_space<vmem>>) attributes {dimension_semantics = [#tpu.dimension_semantics<parallel>], iteration_bounds = array<i64: 1>, scalar_prefetch = 0 : i64, scratch_operands = 0 : i64, tpu.core_type = #tpu.core_type<tc>, window_params = [{transform_indices = @transform_0, window_bounds = array<i64: 8, 128>}, {pipeline_mode = #tpu.pipeline_mode<synchronous>, transform_indices = @transform_1, window_bounds = array<i64: 128, 128>}, {pipeline_mode = #tpu.pipeline_mode<synchronous>, transform_indices = @transform_2, window_bounds = array<i64: 1, 128>}, {pipeline_mode = #tpu.pipeline_mode<synchronous>, transform_indices = @transform_3, window_bounds = array<i64: 128, 128>}, {pipeline_mode = #tpu.pipeline_mode<synchronous>, transform_indices = @transform_4, window_bounds = array<i64: 1, 128>}, {transform_indices = @transform_5, window_bounds = array<i64: 8, 128>}]} {
    %c0 = arith.constant 0 : index
    %c0_0 = arith.constant 0 : index
    %0 = vector.load %arg1[%c0, %c0_0] : memref<8x128xf32, #tpu.memory_space<vmem>>, vector<8x128xf32>
    %c0_1 = arith.constant 0 : index
    %c0_2 = arith.constant 0 : index
    %1 = vector.load %arg2[%c0_1, %c0_2] : memref<128x128xf32, #tpu.memory_space<vmem>>, vector<128x128xf32>
    %cst = arith.constant dense<0.000000e+00> : vector<8x128xf32>
    %2 = tpu.matmul %0, %1, %cst {dimension_numbers = #tpu.dot_dimension_numbers<[1], [0], [0], [1], [0, 0, 1, 1], [], []>} : vector<8x128xf32>, vector<128x128xf32>, vector<8x128xf32> -> vector<8x128xf32>
    %c0_3 = arith.constant 0 : index
    %c0_4 = arith.constant 0 : index
    %3 = vector.load %arg3[%c0_3, %c0_4] : memref<1x128xf32, #tpu.memory_space<vmem>>, vector<1x128xf32>
    %4 = vector.broadcast %3 : vector<1x128xf32> to vector<8x128xf32>
    %5 = arith.addf %2, %4 : vector<8x128xf32>
    %6 = arith.negf %5 : vector<8x128xf32>
    %7 = math.exp %6 : vector<8x128xf32>
    %cst_5 = arith.constant 1.000000e+00 : f32
    %8 = vector.broadcast %cst_5 : f32 to vector<8x128xf32>
    %9 = arith.addf %8, %7 : vector<8x128xf32>
    %10 = arith.divf %8, %9 : vector<8x128xf32>
    %c0_6 = arith.constant 0 : index
    %c0_7 = arith.constant 0 : index
    %11 = vector.load %arg4[%c0_6, %c0_7] : memref<128x128xf32, #tpu.memory_space<vmem>>, vector<128x128xf32>
    %cst_8 = arith.constant dense<0.000000e+00> : vector<8x128xf32>
    %12 = tpu.matmul %10, %11, %cst_8 {dimension_numbers = #tpu.dot_dimension_numbers<[1], [0], [0], [1], [0, 0, 1, 1], [], []>} : vector<8x128xf32>, vector<128x128xf32>, vector<8x128xf32> -> vector<8x128xf32>
    %c0_9 = arith.constant 0 : index
    %c0_10 = arith.constant 0 : index
    %13 = vector.load %arg5[%c0_9, %c0_10] : memref<1x128xf32, #tpu.memory_space<vmem>>, vector<1x128xf32>
    %14 = vector.broadcast %13 : vector<1x128xf32> to vector<8x128xf32>
    %15 = arith.addf %12, %14 : vector<8x128xf32>
    %16 = arith.negf %15 : vector<8x128xf32>
    %17 = math.exp %16 : vector<8x128xf32>
    %cst_11 = arith.constant 1.000000e+00 : f32
    %18 = vector.broadcast %cst_11 : f32 to vector<8x128xf32>
    %19 = arith.addf %18, %17 : vector<8x128xf32>
    %20 = arith.divf %18, %19 : vector<8x128xf32>
    %c0_12 = arith.constant 0 : index
    %c0_13 = arith.constant 0 : index
    %21 = vector.load %arg6[%c0_12, %c0_13] : memref<8x128xf32, #tpu.memory_space<vmem>>, vector<8x128xf32>
    tpu.vector_store %arg6[%c0_12, %c0_13], %20 {strides = array<i32>} : memref<8x128xf32, #tpu.memory_space<vmem>>, vector<8x128xf32>,
    return
  }
  func.func @transform_0(%arg0: i32) -> (i32, i32) {
    %c0_i32 = arith.constant 0 : i32
    %c0_i32_0 = arith.constant 0 : i32
    return %arg0, %c0_i32 : i32, i32
  }
  func.func @transform_1(%arg0: i32) -> (i32, i32) {
    %c0_i32 = arith.constant 0 : i32
    %c0_i32_0 = arith.constant 0 : i32
    %c0_i32_1 = arith.constant 0 : i32
    return %c0_i32, %c0_i32_0 : i32, i32
  }
  func.func @transform_2(%arg0: i32) -> (i32, i32) {
    %c0_i32 = arith.constant 0 : i32
    %c0_i32_0 = arith.constant 0 : i32
    %c0_i32_1 = arith.constant 0 : i32
    return %c0_i32, %c0_i32_0 : i32, i32
  }
  func.func @transform_3(%arg0: i32) -> (i32, i32) {
    %c0_i32 = arith.constant 0 : i32
    %c0_i32_0 = arith.constant 0 : i32
    %c0_i32_1 = arith.constant 0 : i32
    return %c0_i32, %c0_i32_0 : i32, i32
  }
  func.func @transform_4(%arg0: i32) -> (i32, i32) {
    %c0_i32 = arith.constant 0 : i32
    %c0_i32_0 = arith.constant 0 : i32
    %c0_i32_1 = arith.constant 0 : i32
    return %c0_i32, %c0_i32_0 : i32, i32
  }
  func.func @transform_5(%arg0: i32) -> (i32, i32) {
    %c0_i32 = arith.constant 0 : i32
    %c0_i32_0 = arith.constant 0 : i32
    return %arg0, %c0_i32 : i32, i32
  }
}

</mosaic_0001>

<bundles_post_ra>
// kernel: tpu_custom_call.1
= control target key start
LH: loop header
LB: loop body
LE: loop exit
PB: predicated region body
PF: predicated region fallthrough
CT: control target
= control target key end

     0   :  { %10 = vsyncpa [#allocation3], 0  ;;  %s576_s0 = inlined_call_operand.hbm [shape: f32[8,128], index: 0, kind: input, shape index: {}]   ;;  %s577_s1 = inlined_call_operand.hbm [shape: f32[128,128], index: 1, kind: input, shape index: {}]   ;;  %s578_s2 = inlined_call_operand.vmem [shape: f32[1,128], index: 2, kind: input, shape index: {}]   ;;  %s579_s3 = inlined_call_operand.hbm [shape: f32[128,128], index: 3, kind: input, shape index: {}]   ;;  %s580_s4 = inlined_call_operand.vmem [shape: f32[1,128], index: 4, kind: input, shape index: {}]   ;;  %s581_s5 = inlined_call_operand.hbm [shape: f32[8,128], index: 5, kind: output, shape index: {}]  }
   0x1   :  { %11 = vsyncpa [#allocation6], 0 }
   0x2   :  { %12 = vsyncpa [#allocation4], 0  ;;  %s486_s18 = smov [#allocation5]  }
   0x3   :  { %s28_s19 = sshll.u32 %s486_s18, 4  ;;  %s29_s19 = int_to_ptr.vmem [resolvable:$true] %s28_s19 }
   0x4   :  { %s408_s20 = scalar_lea.vmem %s29_s19, 2048  ;;  %p413_p1 = scmp.lt.s32.totalorder %s29_s19, %s29_s19 }
   0x5   :  { %p409_p0 = scmp.ne.s32.totalorder %s29_s19, %s408_s20  ;;  %p414_p2 = scmp.lt.s32.totalorder %s408_s20, %s408_s20 }
   0x7   :  { %p415_p3 = por %p414_p2, %p413_p1 }
   0x9   :  { %p416_p4 = pnand %p415_p3, %p409_p0 }
   0xb   :  { %419 = shalt.err (!%p416_p4)
}
   0xc   :  { %s487_s21 = smov 128   ;;  %s488_s22 = smov 8  }
   0xd   :  { %34 = dma.hbm_to_vmem [thread:$0]  %s577_s1, 2048, %s29_s19, [#allocation6], %s487_s21, %s487_s21, %s488_s22  }
   0xe   :  { %s489_s25 = smov [#allocation2]   ;;  %s490_s27 = smov [#allocation7]  }
   0xf   :  { %s19_s26 = sshll.u32 %s489_s25, 4  ;;  %s42_s28 = sshll.u32 %s490_s27, 4  ;;  %s20_s26 = int_to_ptr.vmem [resolvable:$true] %s19_s26  ;;  %s43_s28 = int_to_ptr.vmem [resolvable:$true] %s42_s28 }
  0x10   :  { %s428_s29 = scalar_lea.vmem %s20_s26, 128  ;;  %p433_p6 = scmp.lt.s32.totalorder %s20_s26, %s20_s26 }
  0x11   :  { %p429_p5 = scmp.ne.s32.totalorder %s20_s26, %s428_s29  ;;  %p434_p7 = scmp.lt.s32.totalorder %s428_s29, %s428_s29 }
  0x13   :  { %p435_p8 = por %p434_p7, %p433_p6 }
  0x15   :  { %p436_p9 = pnand %p435_p8, %p429_p5 }
  0x17   :  { %439 = shalt.err (!%p436_p9)
}
  0x18   :  { %22 = dma.hbm_to_vmem [thread:$0]  %s576_s0, 128, %s20_s26, [#allocation3]  }
  0x19   :  { %s448_s7 = scalar_lea.vmem %s43_s28, 2048  ;;  %p453_p11 = scmp.lt.s32.totalorder %s43_s28, %s43_s28 }
  0x1a   :  { %p449_p10 = scmp.ne.s32.totalorder %s43_s28, %s448_s7  ;;  %p454_p12 = scmp.lt.s32.totalorder %s448_s7, %s448_s7 }
  0x1c   :  { %p455_p13 = por %p454_p12, %p453_p11 }
  0x1e   :  { %p456_p0 = pnand %p455_p13, %p449_p10 }
  0x20   :  { %459 = shalt.err (!%p456_p0)
}
  0x21   :  { %48 = dma.hbm_to_vmem [thread:$0]  %s579_s3, 2048, %s43_s28, [#allocation6], %s487_s21, %s487_s21, %s488_s22  }
  0x22   :  { %480 = dma.done.wait [#allocation3], 128  }
  0x23   :  { %481 = vsyncadd [#allocation3], 4294967168 }
  0x24   :  { %482 = dma.done.wait [#allocation6], 4096  }
  0x25   :  { %483 = vsyncadd [#allocation6], 4294963200  ;;  %v491_v0 = vmov 0.0   ;;  %vm492_vm0 = vmmov 0   ;;  %v76_v1 = vld [vmem:[#allocation5 + $0x78] sm:$0xff]  ;;  %v75_v2 = vld [vmem:[#allocation5 + $0x70] sm:$0xff] }
  0x26   :  { %314 = vmatprep.subr.mxu0 %v491_v0  ;;  %346 = vmatprep.mubr.msk.f32.mxu0 %vm492_vm0, %v491_v0  ;;  %v74_v3 = vld [vmem:[#allocation5 + $0x68] sm:$0xff]  ;;  %v73_v4 = vld [vmem:[#allocation5 + $0x60] sm:$0xff]  ;;  %v72_v5 = vld [vmem:[#allocation5 + $0x58] sm:$0xff] }
  0x27   :  { %349 = vmatprep.subr.mxu1 %v491_v0  ;;  %381 = vmatprep.mubr.msk.f32.mxu1 %vm492_vm0, %v491_v0  ;;  %v71_v6 = vld [vmem:[#allocation5 + $0x50] sm:$0xff]  ;;  %v70_v7 = vld [vmem:[#allocation5 + $0x48] sm:$0xff]  ;;  %v69_v8 = vld [vmem:[#allocation5 + $0x40] sm:$0xff] }
  0x28   :  { %315 = vmatpush3.msra.mxu0 %v76_v1  ;;  %v68_v9 = vld [vmem:[#allocation5 + $0x38] sm:$0xff]  ;;  %v67_v10 = vld [vmem:[#allocation5 + $0x30] sm:$0xff]  ;;  %v66_v11 = vld [vmem:[#allocation5 + $0x28] sm:$0xff] }
  0x29   :  { %316 = vmatprep.subr.mxu0 %v491_v0  ;;  %v65_v12 = vld [vmem:[#allocation5 + $0x20] sm:$0xff]  ;;  %v64_v13 = vld [vmem:[#allocation5 + $0x18] sm:$0xff]  ;;  %v63_v14 = vld [vmem:[#allocation5 + $0x10] sm:$0xff] }
  0x2a   :  { %317 = vmatpush3.msra.mxu0 %v75_v2  ;;  %v62_v15 = vld [vmem:[#allocation5 + $0x8] sm:$0xff]  ;;  %v61_v16 = vld [vmem:[#allocation5] sm:$0xff]  ;;  %v60_v17 = vld [vmem:[#allocation2] sm:$0xff] }
  0x2b   :  { %318 = vmatprep.subr.mxu0 %v491_v0  ;;  %v175_v18 = vld [vmem:[#allocation7 + $0x78] sm:$0xff]  ;;  %v174_v19 = vld [vmem:[#allocation7 + $0x70] sm:$0xff]  ;;  %v173_v20 = vld [vmem:[#allocation7 + $0x68] sm:$0xff] }
  0x2c   :  { %319 = vmatpush3.msra.mxu0 %v74_v3  ;;  %350 = vmatpush3.msra.mxu1 %v175_v18  ;;  %v172_v21 = vld [vmem:[#allocation7 + $0x60] sm:$0xff]  ;;  %v171_v22 = vld [vmem:[#allocation7 + $0x58] sm:$0xff]  ;;  %v170_v23 = vld [vmem:[#allocation7 + $0x50] sm:$0xff] }
  0x2d   :  { %320 = vmatprep.subr.mxu0 %v491_v0  ;;  %351 = vmatprep.subr.mxu1 %v491_v0  ;;  %v169_v24 = vld [vmem:[#allocation7 + $0x48] sm:$0xff]  ;;  %v168_v25 = vld [vmem:[#allocation7 + $0x40] sm:$0xff]  ;;  %v167_v26 = vld [vmem:[#allocation7 + $0x38] sm:$0xff] }
  0x2e   :  { %321 = vmatpush3.msra.mxu0 %v73_v4  ;;  %352 = vmatpush3.msra.mxu1 %v174_v19  ;;  %v166_v27 = vld [vmem:[#allocation7 + $0x30] sm:$0xff]  ;;  %v165_v28 = vld [vmem:[#allocation7 + $0x28] sm:$0xff]  ;;  %v164_v29 = vld [vmem:[#allocation7 + $0x20] sm:$0xff] }
  0x2f   :  { %322 = vmatprep.subr.mxu0 %v491_v0  ;;  %353 = vmatprep.subr.mxu1 %v491_v0  ;;  %v163_v30 = vld [vmem:[#allocation7 + $0x18] sm:$0xff]  ;;  %v162_v31 = vld [vmem:[#allocation7 + $0x10] sm:$0xff]  ;;  %v161_v32 = vld [vmem:[#allocation7 + $0x8] sm:$0xff] }
  0x30   :  { %323 = vmatpush3.msra.mxu0 %v72_v5  ;;  %354 = vmatpush3.msra.mxu1 %v173_v20  ;;  %v160_v33 = vld [vmem:[#allocation7] sm:$0xff]  ;;  %v276_v34 = vld [vmem:[%s578_s2] ss:$0 sm:$0xff]  ;;  %s493_s2 = smov [#allocation8]  }
  0x31   :  { %324 = vmatprep.subr.mxu0 %v491_v0  ;;  %355 = vmatprep.subr.mxu1 %v491_v0  ;;  %v278_v42 = vld [vmem:[%s580_s4] ss:$0 sm:$0xff]  ;;  %s266_s11 = sshll.u32 %s493_s2, 4  ;;  %s267_s11 = int_to_ptr.vmem [resolvable:$true] %s266_s11 }
  0x32   :  { %325 = vmatpush3.msra.mxu0 %v71_v6  ;;  %356 = vmatpush3.msra.mxu1 %v172_v21  ;;  %s460_s12 = scalar_lea.vmem %s267_s11, 128  ;;  %p465_p2 = scmp.lt.s32.totalorder %s267_s11, %s267_s11 }
  0x33   :  { %326 = vmatprep.subr.mxu0 %v491_v0  ;;  %357 = vmatprep.subr.mxu1 %v491_v0  ;;  %p461_p1 = scmp.ne.s32.totalorder %s267_s11, %s460_s12  ;;  %p466_p3 = scmp.lt.s32.totalorder %s460_s12, %s460_s12 }
  0x34   :  { %327 = vmatpush3.msra.mxu0 %v70_v7  ;;  %358 = vmatpush3.msra.mxu1 %v171_v22 }
  0x35   :  { %328 = vmatprep.subr.mxu0 %v491_v0  ;;  %359 = vmatprep.subr.mxu1 %v491_v0  ;;  %p467_p4 = por %p466_p3, %p465_p2 }
  0x36   :  { %329 = vmatpush3.msra.mxu0 %v69_v8  ;;  %360 = vmatpush3.msra.mxu1 %v170_v23 }
  0x37   :  { %330 = vmatprep.subr.mxu0 %v491_v0  ;;  %361 = vmatprep.subr.mxu1 %v491_v0  ;;  %p468_p5 = pnand %p467_p4, %p461_p1 }
  0x38   :  { %331 = vmatpush3.msra.mxu0 %v68_v9  ;;  %362 = vmatpush3.msra.mxu1 %v169_v24 }
  0x39   :  { %332 = vmatprep.subr.mxu0 %v491_v0  ;;  %363 = vmatprep.subr.mxu1 %v491_v0 }
  0x3a   :  { %333 = vmatpush3.msra.mxu0 %v67_v10  ;;  %364 = vmatpush3.msra.mxu1 %v168_v25 }
  0x3b   :  { %334 = vmatprep.subr.mxu0 %v491_v0  ;;  %365 = vmatprep.subr.mxu1 %v491_v0 }
  0x3c   :  { %335 = vmatpush3.msra.mxu0 %v66_v11  ;;  %366 = vmatpush3.msra.mxu1 %v167_v26 }
  0x3d   :  { %336 = vmatprep.subr.mxu0 %v491_v0  ;;  %367 = vmatprep.subr.mxu1 %v491_v0 }
  0x3e   :  { %337 = vmatpush3.msra.mxu0 %v65_v12  ;;  %368 = vmatpush3.msra.mxu1 %v166_v27 }
  0x3f   :  { %338 = vmatprep.subr.mxu0 %v491_v0  ;;  %369 = vmatprep.subr.mxu1 %v491_v0 }
  0x40   :  { %339 = vmatpush3.msra.mxu0 %v64_v13  ;;  %370 = vmatpush3.msra.mxu1 %v165_v28 }
  0x41   :  { %340 = vmatprep.subr.mxu0 %v491_v0  ;;  %371 = vmatprep.subr.mxu1 %v491_v0 }
  0x42   :  { %341 = vmatpush3.msra.mxu0 %v63_v14  ;;  %372 = vmatpush3.msra.mxu1 %v164_v29 }
  0x43   :  { %342 = vmatprep.subr.mxu0 %v491_v0  ;;  %373 = vmatprep.subr.mxu1 %v491_v0 }
  0x44   :  { %343 = vmatpush3.msra.mxu0 %v62_v15  ;;  %374 = vmatpush3.msra.mxu1 %v163_v30 }
  0x45   :  { %344 = vmatprep.subr.mxu0 %v491_v0  ;;  %375 = vmatprep.subr.mxu1 %v491_v0 }
  0x46   :  { %345 = vmatpush3.msra.mxu0 %v61_v16  ;;  %376 = vmatpush3.msra.mxu1 %v162_v31 }
  0x47   :  { %347 = vmatmul.mubr.f32.vlgmr.msra.gmra.mxu0 %v60_v17  ;;  %377 = vmatprep.subr.mxu1 %v491_v0 }
  0x48   :  { %378 = vmatpush3.msra.mxu1 %v161_v32 }
  0x49   :  { %379 = vmatprep.subr.mxu1 %v491_v0 }
  0x4a   :  { %380 = vmatpush3.msra.mxu1 %v160_v33 }
 0x107   :  { %v150_v35 = vpop.f32.mrf.mxu0 }
 0x108   :  { %v151_v36 = vadd.f32 %v276_v34, %v150_v35 }
 0x109   :  { %v348_v37 = vpop.f32.mrf.mxu0 }
 0x10a   :  { %v277_v38 = vmul.f32 -1.442695, %v151_v36 }
 0x10c   :  { %392 = vpow2.f32 %v277_v38 }
 0x119   :  { %v393_v39 = vpop.eup %392 }
 0x11a   :  { %v157_v40 = vadd.f32 1.0, %v393_v39 }
 0x11c   :  { %394 = vrcp.f32 %v157_v40 }
 0x129   :  { %v395_v41 = vpop.eup %394 }
 0x12a   :  { %382 = vmatmul.mubr.f32.vlgmr.msra.gmra.mxu1 %v395_v41 }
 0x1ea   :  { %v249_v43 = vpop.f32.mrf.mxu1 }
 0x1eb   :  { %v250_v44 = vadd.f32 %v278_v42, %v249_v43 }
 0x1ec   :  { %v383_v45 = vpop.f32.mrf.mxu1 }
 0x1ed   :  { %v279_v46 = vmul.f32 -1.442695, %v250_v44 }
 0x1ef   :  { %396 = vpow2.f32 %v279_v46 }
 0x1fc   :  { %v397_v47 = vpop.eup %396 }
 0x1fd   :  { %v256_v48 = vadd.f32 1.0, %v397_v47 }
 0x1ff   :  { %398 = vrcp.f32 %v256_v48 }
 0x20c   :  { %v399_v49 = vpop.eup %398 }
 0x20d   :  { %259 = vst [vmem:[#allocation8] sm:$0xff] %v399_v49 }
 0x20e   :  { %471 = shalt.err (!%p468_p5)
}
 0x20f   :  { %269 = dma.vmem_to_hbm [thread:$0]  %s267_s11, 128, %s581_s5, [#allocation4]  }
 0x210   :  { %484 = dma.done.wait [#allocation4], 128  }
 0x211   :  { %485 = vsyncadd [#allocation4], 4294967168 }
 0x212   :  { %273 = vsyncpa [#allocation3], 1 }
 0x213   :  { %274 = vsyncpa [#allocation6], 1 }
 0x214   :  { %275 = vsyncpa [#allocation4], 1 }

</bundles_post_ra>
